<compile_context>
chip_gen: v7x
topology: tpu7x:2x2x1
jax: 0.10.0
libtpu: 0.0.40
codegen_flags: <defaults>
</compile_context>

<pallas_src>
import functools

import jax
import jax.numpy as jnp
from jax.experimental import pallas as pl
from jax.experimental.pallas import tpu as pltpu


def _round_up(n, m):
    return ((n + m - 1) // m) * m


def _frame_avg_hp_mix_kernel(x_ref, o_ref, *, win_len, pad, mode, mix_weight,
                             eps, use_cumsum):
    x = x_ref[...].astype(jnp.float32)
    tm, T = x.shape

    def shift_right_zero(v, s):
        # result[:, t] = v[:, t - s] for t >= s, else 0.
        if s <= 0:
            return v
        if s >= T:
            return jnp.zeros((tm, T), jnp.float32)
        return jnp.concatenate(
            [jnp.zeros((tm, s), jnp.float32), v[:, :T - s]], axis=-1)

    def shift_left_fill(v, s, fill_col=None):
        # result[:, t] = v[:, t + s] for t < T - s, else fill_col (or 0).
        if s <= 0:
            return v
        width = min(s, T)
        if fill_col is None:
            tail = jnp.zeros((tm, width), jnp.float32)
        else:
            tail = jnp.broadcast_to(fill_col, (tm, width))
        if s >= T:
            return tail
        return jnp.concatenate([v[:, s:], tail], axis=-1)

    if win_len <= 1:
        x_lp = x
    elif use_cumsum:
        # Box filter via inclusive prefix sum (Hillis-Steele scan, ceil(log2 T)
        # steps of shift + add) -> ~2 extra shifts instead of win_len taps.
        c = x
        step = 1
        while step < T:
            c = c + shift_right_zero(c, step)
            step *= 2
        last = c[:, T - 1:T]                       # per-row total sum
        c_hi = shift_left_fill(c, pad, last)       # c(min(t + pad, T - 1))
        c_lo = shift_right_zero(c, pad + 1)        # c(t - pad - 1), 0 for t <= pad
        x_lp = (c_hi - c_lo) * jnp.float32(1.0 / win_len)
    else:
        # Small window: win_len - 1 shifted taps, accumulated round-robin into
        # two chains so the VALU adds can overlap with the XLU shifts.
        acc_a = x                                  # tap at offset 0
        acc_b = None
        offs = [d for d in range(-pad, pad + 1) if d != 0]
        for i, d in enumerate(offs):
            tap = shift_left_fill(x, d) if d > 0 else shift_right_zero(x, -d)
            if i % 2 == 0:
                acc_a = acc_a + tap
            elif acc_b is None:
                acc_b = tap
            else:
                acc_b = acc_b + tap
        acc = acc_a if acc_b is None else acc_a + acc_b
        x_lp = acc * jnp.float32(1.0 / win_len)

    if mode == "rms":
        # EUP sqrt on the smoothed signal (matches the PyTorch module).
        x_lp = jnp.sqrt(x_lp * x_lp + jnp.float32(eps))

    w = jnp.float32(mix_weight)
    out = w * x + (jnp.float32(1.0) - w) * x_lp
    o_ref[...] = out.astype(o_ref.dtype)


def frame_average_high_pass_mix(x, fs, window_size_ms=2.0, mode="mean",
                                mix_weight=1.0, eps=1e-8):
    mode = mode.lower()
    if mode not in ("mean", "rms"):
        raise ValueError("mode must be 'mean' or 'rms'")
    if x.ndim != 3:
        raise ValueError("expected input of shape (batch, channels, time)")

    win_len = int(round(window_size_ms * fs / 1000))
    if win_len < 1:
        raise ValueError("window_size_ms * fs must give a window of >= 1 sample")
    if win_len % 2 == 0:
        # Conv1d with padding=(win_len-1)//2 only preserves T for odd windows;
        # the reference module's residual add is ill-defined otherwise.
        raise ValueError("win_len must be odd to keep the 'same' time resolution")
    pad = (win_len - 1) // 2

    B, C, T = x.shape

    # ---- fast paths (no HBM traffic) ----------------------------------------
    # x_hp is computed against the post-rms low-pass, so out == x exactly
    # whenever mix_weight == 1 (both modes), and when win_len == 1 with 'mean'.
    if float(mix_weight) == 1.0:
        return x
    if win_len == 1 and mode == "mean":
        return x

    rows = B * C
    x2 = x.reshape(rows, T)

    use_cumsum = win_len > 16

    # ---- generation-aware VMEM budget / row-tile sizing ----------------------
    try:
        vmem_cap = int(pltpu.get_tpu_info().vmem_capacity_bytes)
    except Exception:
        vmem_cap = 64 * 1024 * 1024  # conservative (v7x per-TC) fallback
    vmem_limit = min(max(vmem_cap // 2, 32 * 1024 * 1024), 64 * 1024 * 1024)
    budget_bytes = (vmem_limit * 3) // 4  # leave headroom for compiler scratch

    itemsize = jnp.dtype(x.dtype).itemsize
    # double-buffered in+out blocks + ~6 live f32 temporaries per row.
    per_row_bytes = 4 * T * itemsize + 24 * T
    tm_cap = max(8, (budget_bytes // max(per_row_bytes, 1)) // 8 * 8)
    tm = max(8, min(1024, _round_up(rows, 8), tm_cap))
    # v7x megacore: keep at least 2 row blocks so ("parallel",) shards across TCs.
    if rows > 8:
        tm = max(8, min(tm, _round_up((rows + 1) // 2, 8)))

    # TODO(synk): halo-tiled time axis for very long T (full-T block > budget
    # even at tm=8); currently each block spans the full time axis so stores
    # stay lane-dense.

    kernel = functools.partial(
        _frame_avg_hp_mix_kernel,
        win_len=win_len, pad=pad, mode=mode,
        mix_weight=float(mix_weight), eps=float(eps), use_cumsum=use_cumsum)

    out2 = pl.pallas_call(
        kernel,
        out_shape=jax.ShapeDtypeStruct((rows, T), x.dtype),
        grid=(pl.cdiv(rows, tm),),
        in_specs=[pl.BlockSpec((tm, T), lambda i: (i, 0))],
        out_specs=pl.BlockSpec((tm, T), lambda i: (i, 0)),
        compiler_params=pltpu.CompilerParams(
            dimension_semantics=("parallel",),
            vmem_limit_bytes=int(vmem_limit),
        ),
    )(x2)
    return out2.reshape(B, C, T)


def _reference(x, win_len, mode, mix_weight, eps):
    # Pure-JAX reference mirroring the PyTorch module's forward.
    pad = (win_len - 1) // 2
    T = x.shape[-1]
    xf = x.astype(jnp.float32)
    xp = jnp.pad(xf, ((0, 0), (0, 0), (pad, win_len - 1 - pad)))
    frames = jnp.stack([xp[..., k:k + T] for k in range(win_len)], axis=-1)
    x_lp = frames.mean(axis=-1)
    if mode == "rms":
        x_lp = jnp.sqrt(x_lp * x_lp + eps)
    out = x_lp + mix_weight * (xf - x_lp)
    return out.astype(x.dtype)


if __name__ == "__main__":
    key = jax.random.PRNGKey(0)
    k1, k2 = jax.random.split(key)
    fs = 1000.0

    # --- small shapes, small window (shifted-add path) -----------------------
    B, C, T = 2, 4, 512
    x = jax.random.normal(k1, (B, C, T), dtype=jnp.float32)

    # 1) identity fast path: mix_weight == 1 -> out == x exactly (no kernel).
    y = jax.block_until_ready(
        frame_average_high_pass_mix(x, fs, window_size_ms=5.0, mode="mean",
                                    mix_weight=1.0, eps=1e-8))
    assert y.shape == (B, C, T)
    assert bool(jnp.array_equal(y, x))

    # 2) small-window kernel path, mean / rms.
    for mode, mw in (("mean", 0.3), ("rms", 0.5)):
        y = jax.block_until_ready(
            frame_average_high_pass_mix(x, fs, window_size_ms=5.0, mode=mode,
                                        mix_weight=mw, eps=1e-8))
        y_ref = _reference(x, win_len=5, mode=mode, mix_weight=mw, eps=1e-8)
        assert y.shape == (B, C, T)
        err = float(jnp.max(jnp.abs(y - y_ref)))
        assert jnp.allclose(y, y_ref, atol=1e-5, rtol=1e-5), (mode, mw, err)

    # --- larger window (cumsum box-filter path), odd row count (partial block,
    #     >= 2 grid steps) ----------------------------------------------------
    B2, C2, T2 = 3, 5, 640
    x2 = jax.random.normal(k2, (B2, C2, T2), dtype=jnp.float32)
    for mode, mw in (("mean", 0.25), ("rms", 0.5)):
        y2 = jax.block_until_ready(
            frame_average_high_pass_mix(x2, fs, window_size_ms=33.0, mode=mode,
                                        mix_weight=mw, eps=1e-8))
        y2_ref = _reference(x2, win_len=33, mode=mode, mix_weight=mw, eps=1e-8)
        assert y2.shape == (B2, C2, T2)
        err = float(jnp.max(jnp.abs(y2 - y2_ref)))
        assert jnp.allclose(y2, y2_ref, atol=1e-4, rtol=1e-4), (mode, mw, err)

    print("KERNEL_OK")
</pallas_src>

<mosaic_0001>
module attributes {stable_mosaic.version = 11 : i64} {
  func.func @_frame_avg_hp_mix_kernel(%arg0: i32, %arg1: memref<8x512xf32, #tpu.memory_space<vmem>>, %arg2: memref<8x512xf32, #tpu.memory_space<vmem>>) attributes {dimension_semantics = [#tpu.dimension_semantics<parallel>], iteration_bounds = array<i64: 1>, scalar_prefetch = 0 : i64, scratch_operands = 0 : i64, tpu.core_type = #tpu.core_type<tc>, window_params = [{transform_indices = @transform_0, window_bounds = array<i64: 8, 512>}, {transform_indices = @transform_1, window_bounds = array<i64: 8, 512>}]} {
    %c0 = arith.constant 0 : index
    %c0_0 = arith.constant 0 : index
    %0 = vector.load %arg1[%c0, %c0_0] : memref<8x512xf32, #tpu.memory_space<vmem>>, vector<8x512xf32>
    %cst = arith.constant 0.000000e+00 : f32
    %1 = vector.broadcast %cst : f32 to vector<8x2xf32>
    %2 = vector.extract_strided_slice %0 {offsets = [0, 0], sizes = [8, 510], strides = [1, 1]} : vector<8x512xf32> to vector<8x510xf32>
    %3 = tpu.concatenate %1, %2 in 1 : vector<8x2xf32>, vector<8x510xf32> -> vector<8x512xf32>
    %4 = arith.addf %0, %3 : vector<8x512xf32>
    %cst_1 = arith.constant 0.000000e+00 : f32
    %5 = vector.broadcast %cst_1 : f32 to vector<8x1xf32>
    %6 = vector.extract_strided_slice %0 {offsets = [0, 0], sizes = [8, 511], strides = [1, 1]} : vector<8x512xf32> to vector<8x511xf32>
    %7 = tpu.concatenate %5, %6 in 1 : vector<8x1xf32>, vector<8x511xf32> -> vector<8x512xf32>
    %cst_2 = arith.constant 0.000000e+00 : f32
    %8 = vector.broadcast %cst_2 : f32 to vector<8x1xf32>
    %9 = vector.extract_strided_slice %0 {offsets = [0, 1], sizes = [8, 511], strides = [1, 1]} : vector<8x512xf32> to vector<8x511xf32>
    %10 = tpu.concatenate %9, %8 in 1 : vector<8x511xf32>, vector<8x1xf32> -> vector<8x512xf32>
    %11 = arith.addf %4, %10 : vector<8x512xf32>
    %cst_3 = arith.constant 0.000000e+00 : f32
    %12 = vector.broadcast %cst_3 : f32 to vector<8x2xf32>
    %13 = vector.extract_strided_slice %0 {offsets = [0, 2], sizes = [8, 510], strides = [1, 1]} : vector<8x512xf32> to vector<8x510xf32>
    %14 = tpu.concatenate %13, %12 in 1 : vector<8x510xf32>, vector<8x2xf32> -> vector<8x512xf32>
    %15 = arith.addf %7, %14 : vector<8x512xf32>
    %16 = arith.addf %11, %15 : vector<8x512xf32>
    %cst_4 = arith.constant 2.000000e-01 : f32
    %17 = vector.broadcast %cst_4 : f32 to vector<8x512xf32>
    %18 = arith.mulf %16, %17 : vector<8x512xf32>
    %cst_5 = arith.constant 3.000000e-01 : f32
    %19 = vector.broadcast %cst_5 : f32 to vector<8x512xf32>
    %20 = arith.mulf %19, %0 : vector<8x512xf32>
    %cst_6 = arith.constant 1.000000e+00 : f32
    %cst_7 = arith.constant 3.000000e-01 : f32
    %21 = arith.subf %cst_6, %cst_7 : f32
    %22 = vector.broadcast %21 : f32 to vector<8x512xf32>
    %23 = arith.mulf %22, %18 : vector<8x512xf32>
    %24 = arith.addf %20, %23 : vector<8x512xf32>
    %c0_8 = arith.constant 0 : index
    %c0_9 = arith.constant 0 : index
    %25 = vector.load %arg2[%c0_8, %c0_9] : memref<8x512xf32, #tpu.memory_space<vmem>>, vector<8x512xf32>
    tpu.vector_store %arg2[%c0_8, %c0_9], %24 {strides = array<i32>} : memref<8x512xf32, #tpu.memory_space<vmem>>, vector<8x512xf32>,
    return
  }
  func.func @transform_0(%arg0: i32) -> (i32, i32) {
    %c0_i32 = arith.constant 0 : i32
    %c0_i32_0 = arith.constant 0 : i32
    return %arg0, %c0_i32 : i32, i32
  }
  func.func @transform_1(%arg0: i32) -> (i32, i32) {
    %c0_i32 = arith.constant 0 : i32
    %c0_i32_0 = arith.constant 0 : i32
    return %arg0, %c0_i32 : i32, i32
  }
}

</mosaic_0001>

<bundles_post_ra>
// kernel: tpu_custom_call.1
= control target key start
LH: loop header
LB: loop body
LE: loop exit
PB: predicated region body
PF: predicated region fallthrough
CT: control target
= control target key end

     0   :  { %6 = vsyncpa [#allocation3], 0  ;;  %s278_s0 = inlined_call_operand.hbm [shape: f32[8,512], index: 0, kind: input, shape index: {}]   ;;  %s279_s1 = inlined_call_operand.hbm [shape: f32[8,512], index: 1, kind: output, shape index: {}]  }
   0x1   :  { %7 = vsyncpa [#allocation4], 0  ;;  %s202_s6 = smov [#allocation2]   ;;  %s154_s10 = scalar_lea.hbm %s278_s0, 512 }
   0x2   :  { %s14_s7 = sshll.u32 %s202_s6, 4  ;;  %p155_p0 = scmp.ne.s32.totalorder %s278_s0, %s154_s10  ;;  %s15_s7 = int_to_ptr.vmem [resolvable:$true] %s14_s7 }
   0x3   :  { %p158_p1 = scmp.lt.u32.totalorder %s154_s10, %s278_s0 }
   0x5   :  { %p160_p2 = pnand %p158_p1, %p155_p0 }
   0x7   :  { %163 = shalt.err (!%p160_p2)
}
   0x8   :  { %s164_s15 = scalar_lea.vmem %s15_s7, 512  ;;  %p169_p4 = scmp.lt.s32.totalorder %s15_s7, %s15_s7 }
   0x9   :  { %p165_p3 = scmp.ne.s32.totalorder %s15_s7, %s164_s15  ;;  %p170_p5 = scmp.lt.s32.totalorder %s164_s15, %s164_s15 }
   0xb   :  { %p171_p6 = por %p170_p5, %p169_p4 }
   0xd   :  { %p172_p7 = pnand %p171_p6, %p165_p3 }
   0xf   :  { %175 = shalt.err (!%p172_p7)
}
  0x10   :  { %17 = dma.hbm_to_vmem [thread:$0]  %s278_s0, 512, %s15_s7, [#allocation3]  }
  0x11   :  { %198 = dma.done.wait [#allocation3], 512  }
  0x12   :  { %199 = vsyncadd [#allocation3], 4294966784  ;;  %v230_v0 = vld [vmem:[#allocation2 + $0x10] sm:$0xff]  ;;  %v21_v1 = vld [vmem:[#allocation2] sm:$0xff]  ;;  %s203_s18 = smov 2   ;;  %s204_s19 = smov 1  }
  0x13   :  { %33 = vrot.lane.b32.xlu1 %v230_v0, %s203_s18  ;;  %29 = vrot.lane.b32.xlu0 %v21_v1, %s203_s18  ;;  %v233_v2 = vld [vmem:[#allocation2 + $0x18] sm:$0xff]  ;;  %v235_v3 = vld [vmem:[#allocation2 + $0x8] sm:$0xff]  ;;  %s205_s0 = smov 127   ;;  %s206_s20 = smov 126   ;;  %vm37_vm0 = vcmask 15360   ;;  %vm75_vm1 = vcmask 1039360  }
  0x14   :  { %vm58_vm2 = vcmask 7168   ;;  %vm96_vm3 = vcmask 1031168   ;;  %v117_v36 = vmul.f32 0.3, %v21_v1  ;;  %v120_v55 = vmul.f32 0.3, %v233_v2 }
  0x15   :  { %v118_v56 = vmul.f32 0.3, %v235_v3  ;;  %v119_v57 = vmul.f32 0.3, %v230_v0  ;;  %s207_s21 = smov [#allocation5]  }
  0x16   :  { %s139_s22 = sshll.u32 %s207_s21, 4  ;;  %s140_s22 = int_to_ptr.vmem [resolvable:$true] %s139_s22 }
  0x17   :  { %35 = vrot.lane.b32.xlu1 %v233_v2, %s203_s18  ;;  %31 = vrot.lane.b32.xlu0 %v235_v3, %s203_s18  ;;  %s176_s23 = scalar_lea.vmem %s140_s22, 512  ;;  %p181_p9 = scmp.lt.s32.totalorder %s140_s22, %s140_s22 }
  0x18   :  { %p177_p8 = scmp.ne.s32.totalorder %s140_s22, %s176_s23  ;;  %p182_p10 = scmp.lt.s32.totalorder %s176_s23, %s176_s23 }
  0x1a   :  { %p183_p11 = por %p182_p10, %p181_p9 }
  0x1b   :  { %52 = vrot.lane.b32.xlu1 %v235_v3, %s204_s19  ;;  %50 = vrot.lane.b32.xlu0 %v21_v1, %s204_s19 }
  0x1c   :  { %p184_p12 = pnand %p183_p11, %p177_p8 }
  0x1f   :  { %56 = vrot.lane.b32.xlu1 %v233_v2, %s204_s19  ;;  %54 = vrot.lane.b32.xlu0 %v230_v0, %s204_s19 }
  0x23   :  { %69 = vrot.lane.b32.xlu1 %v235_v3, %s205_s0  ;;  %67 = vrot.lane.b32.xlu0 %v21_v1, %s205_s0 }
  0x27   :  { %73 = vrot.lane.b32.xlu1 %v233_v2, %s205_s0  ;;  %71 = vrot.lane.b32.xlu0 %v230_v0, %s205_s0 }
  0x2b   :  { %90 = vrot.lane.b32.xlu1 %v235_v3, %s206_s20  ;;  %88 = vrot.lane.b32.xlu0 %v21_v1, %s206_s20 }
  0x2f   :  { %94 = vrot.lane.b32.xlu1 %v233_v2, %s206_s20  ;;  %92 = vrot.lane.b32.xlu0 %v230_v0, %s206_s20 }
  0x85   :  { %v34_v4 = vpop.permute.xlu1 %33  ;;  %v30_v5 = vpop.permute.xlu0 %29 }
  0x86   :  { %v45_v16 = vsel %vm37_vm0, 0.0, %v30_v5 }
  0x87   :  { %v46_v20 = vadd.f32 %v45_v16, %v21_v1 }
  0x89   :  { %v36_v6 = vpop.permute.xlu1 %35  ;;  %v32_v7 = vpop.permute.xlu0 %31 }
  0x8a   :  { %v40_v17 = vsel %vm37_vm0, %v34_v4, %v36_v6  ;;  %v38_v18 = vsel %vm37_vm0, %v30_v5, %v32_v7  ;;  %v39_v22 = vsel %vm37_vm0, %v32_v7, %v34_v4 }
  0x8b   :  { %v49_v21 = vadd.f32 %v40_v17, %v233_v2  ;;  %v47_v29 = vadd.f32 %v38_v18, %v235_v3  ;;  %v48_v33 = vadd.f32 %v39_v22, %v230_v0 }
  0x8d   :  { %v53_v8 = vpop.permute.xlu1 %52  ;;  %v51_v9 = vpop.permute.xlu0 %50 }
  0x8e   :  { %v66_v25 = vsel %vm58_vm2, 0.0, %v51_v9  ;;  %v59_v34 = vsel %vm58_vm2, %v51_v9, %v53_v8 }
  0x91   :  { %v57_v10 = vpop.permute.xlu1 %56  ;;  %v55_v11 = vpop.permute.xlu0 %54 }
  0x92   :  { %v60_v35 = vsel %vm58_vm2, %v53_v8, %v55_v11  ;;  %v61_v37 = vsel %vm58_vm2, %v55_v11, %v57_v10 }
  0x95   :  { %v70_v12 = vpop.permute.xlu1 %69  ;;  %v68_v13 = vpop.permute.xlu0 %67 }
  0x96   :  { %v76_v19 = vsel %vm75_vm1, %v68_v13, %v70_v12 }
  0x97   :  { %v84_v30 = vadd.f32 %v76_v19, %v46_v20 }
  0x99   :  { %v74_v14 = vpop.permute.xlu1 %73  ;;  %v72_v15 = vpop.permute.xlu0 %71 }
  0x9a   :  { %v83_v26 = vsel %vm75_vm1, %v74_v14, 0.0  ;;  %v77_v27 = vsel %vm75_vm1, %v70_v12, %v72_v15  ;;  %v78_v31 = vsel %vm75_vm1, %v72_v15, %v74_v14 }
  0x9b   :  { %v87_v38 = vadd.f32 %v83_v26, %v49_v21  ;;  %v85_v39 = vadd.f32 %v77_v27, %v47_v29  ;;  %v86_v43 = vadd.f32 %v78_v31, %v48_v33 }
  0x9d   :  { %v91_v23 = vpop.permute.xlu1 %90  ;;  %v89_v24 = vpop.permute.xlu0 %88 }
  0x9e   :  { %v97_v28 = vsel %vm96_vm3, %v89_v24, %v91_v23 }
  0x9f   :  { %v105_v32 = vadd.f32 %v97_v28, %v66_v25 }
  0xa1   :  { %v109_v40 = vadd.f32 %v105_v32, %v84_v30  ;;  %v95_v41 = vpop.permute.xlu1 %94  ;;  %v93_v42 = vpop.permute.xlu0 %92 }
  0xa2   :  { %v104_v44 = vsel %vm96_vm3, %v95_v41, 0.0  ;;  %v98_v45 = vsel %vm96_vm3, %v91_v23, %v93_v42  ;;  %v99_v46 = vsel %vm96_vm3, %v93_v42, %v95_v41 }
  0xa3   :  { %v113_v47 = vmul.f32 0.2, %v109_v40  ;;  %v108_v48 = vadd.f32 %v104_v44, %v61_v37  ;;  %v106_v49 = vadd.f32 %v98_v45, %v59_v34  ;;  %v107_v50 = vadd.f32 %v99_v46, %v60_v35 }
  0xa5   :  { %v121_v51 = vmul.f32 0.7, %v113_v47  ;;  %v112_v52 = vadd.f32 %v108_v48, %v87_v38  ;;  %v110_v53 = vadd.f32 %v106_v49, %v85_v39  ;;  %v111_v54 = vadd.f32 %v107_v50, %v86_v43 }
  0xa7   :  { %v125_v58 = vadd.f32 %v121_v51, %v117_v36  ;;  %v116_v59 = vmul.f32 0.2, %v112_v52  ;;  %v114_v60 = vmul.f32 0.2, %v110_v53  ;;  %v115_v61 = vmul.f32 0.2, %v111_v54 }
  0xa9   :  { %129 = vst [vmem:[#allocation5] sm:$0xff] %v125_v58  ;;  %v124_v62 = vmul.f32 0.7, %v116_v59  ;;  %v122_v63 = vmul.f32 0.7, %v114_v60 }
  0xaa   :  { %v123_v1 = vmul.f32 0.7, %v115_v61 }
  0xab   :  { %v128_v4 = vadd.f32 %v124_v62, %v120_v55  ;;  %v126_v5 = vadd.f32 %v122_v63, %v118_v56 }
  0xac   :  { %v127_v6 = vadd.f32 %v123_v1, %v119_v57 }
  0xad   :  { %132 = vst [vmem:[#allocation5 + $0x18] sm:$0xff] %v128_v4  ;;  %130 = vst [vmem:[#allocation5 + $0x8] sm:$0xff] %v126_v5 }
  0xae   :  { %131 = vst [vmem:[#allocation5 + $0x10] sm:$0xff] %v127_v6 }
  0xaf   :  { %187 = shalt.err (!%p184_p12)
}
  0xb0   :  { %s188_s26 = scalar_lea.hbm %s279_s1, 512 }
  0xb1   :  { %p189_p13 = scmp.ne.s32.totalorder %s279_s1, %s188_s26  ;;  %p192_p0 = scmp.lt.u32.totalorder %s188_s26, %s279_s1 }
  0xb3   :  { %p194_p1 = pnand %p192_p0, %p189_p13 }
  0xb5   :  { %197 = shalt.err (!%p194_p1)
}
  0xb6   :  { %142 = dma.vmem_to_hbm [thread:$0]  %s140_s22, 512, %s279_s1, [#allocation4]  }
  0xb7   :  { %200 = dma.done.wait [#allocation4], 512  }
  0xb8   :  { %201 = vsyncadd [#allocation4], 4294966784 }
  0xb9   :  { %146 = vsyncpa [#allocation3], 1 }
  0xba   :  { %147 = vsyncpa [#allocation4], 1 }

</bundles_post_ra>
